<compile_context>
chip_gen: v6e
topology: v6e:2x2x1
jax: 0.10.0
libtpu: 0.0.40
codegen_flags: <defaults>
</compile_context>

<pallas_src>
import jax
import jax.numpy as jnp
from jax.experimental import pallas as pl
from jax.experimental.pallas import tpu as pltpu

KH = KW = 3  # fixed 3x3 conv


def conv3x3_kernel(x_ref, w_ref, b_ref, o_ref, xpad_ref):
    """TB batch images per grid step.

    x_ref    : VMEM (TB, H, W)      f32  -- unpadded input images
    w_ref    : SMEM (3, 3)          f32  -- conv weight (C_in = C_out = 1)
    b_ref    : SMEM (1,)            f32  -- conv bias
    o_ref    : VMEM (TB, H, W)      f32
    xpad_ref : VMEM (TB, H+2, W+2)  f32  -- scratch holding the zero-halo tile
    """
    TB, H, W = o_ref.shape

    # Build the zero halo in VMEM (cheap VMEM memset + interior copy) instead
    # of a wrapper-side jnp.pad, which would add a full extra HBM read+write
    # pass.  Re-zero every grid step (not just at program_id == 0) so results
    # stay correct when the "parallel" batch axis is sharded across cores.
    xpad_ref[...] = jnp.zeros_like(xpad_ref)
    xpad_ref[:, pl.ds(1, H), pl.ds(1, W)] = x_ref[...]

    # Bias folded into the accumulator init (saves one full H*W add pass).
    acc = jnp.full((TB, H, W), b_ref[0], dtype=jnp.float32)

    # 3 lane-shifted operands (one per column tap kj), each reused across the
    # 3 row taps ki (cheap sublane slices) -> 9 FMAs + 3 lane shifts total.
    for kj in range(KW):
        x_shift = xpad_ref[:, :, pl.ds(kj, W)]          # (TB, H+2, W)
        for ki in range(KH):
            acc = acc + w_ref[ki, kj] * x_shift[:, ki:ki + H, :]

    # TODO(synk): for W not a multiple of 128 this store is lane-masked; a
    # fully lane-dense (TB, H*W) output layout would need an in-kernel
    # reshape of the minor dims, which we avoid for lowering robustness.
    o_ref[...] = acc.astype(o_ref.dtype)


def model_forward(x, weight, bias, *, tb=None):
    """x: (N, 1, H, W) f32; weight: (1, 1, 3, 3) f32; bias: (1,) f32.

    Returns (N, H*W) f32, matching Model.forward.
    """
    N, C, H, W = x.shape
    assert C == 1 and weight.shape == (1, 1, KH, KW) and bias.shape == (1,)

    if tb is None:
        # Keep the input block to a few MiB (pipeline double-buffers it, and
        # the padded scratch + output add ~2x more), and keep >= 2 grid steps
        # when N allows so the batch axis can shard across TensorCores.
        bytes_per_img = H * W * 4
        tb = max(1, min(N, (2 << 20) // max(bytes_per_img, 1)))
        if N >= 2:
            tb = min(tb, pl.cdiv(N, 2))
    tb = max(1, min(tb, N))
    while N % tb != 0:          # avoid partial blocks
        tb -= 1

    x2d = x.reshape(N, H, W)        # squeeze channel (C == 1): free reshape
    w2d = weight.reshape(KH, KW)

    out = pl.pallas_call(
        conv3x3_kernel,
        out_shape=jax.ShapeDtypeStruct((N, H, W), jnp.float32),
        grid_spec=pltpu.PrefetchScalarGridSpec(
            num_scalar_prefetch=0,
            grid=(N // tb,),
            in_specs=[
                pl.BlockSpec((tb, H, W), lambda n: (n, 0, 0)),
                pl.BlockSpec(memory_space=pltpu.MemorySpace.SMEM),
                pl.BlockSpec(memory_space=pltpu.MemorySpace.SMEM),
            ],
            out_specs=pl.BlockSpec((tb, H, W), lambda n: (n, 0, 0)),
            scratch_shapes=[pltpu.VMEM((tb, H + 2, W + 2), jnp.float32)],
        ),
        compiler_params=pltpu.CompilerParams(
            dimension_semantics=("parallel",)),
    )(x2d, w2d, bias)

    # view(-1, numel // N) -> (N, C_out*H*W) = (N, H*W); free metadata reshape.
    return out.reshape(N, H * W)


def _reference(x, weight, bias):
    """Pure-JAX reference conv (NCHW, pad=1, stride=1) for validation."""
    y = jax.lax.conv_general_dilated(
        x, weight, window_strides=(1, 1), padding=((1, 1), (1, 1)),
        dimension_numbers=("NCHW", "OIHW", "NCHW"))
    y = y + bias.reshape(1, 1, 1, 1)
    return y.reshape(x.shape[0], -1)


if __name__ == "__main__":
    # Parameters: deterministic, as in Model.__init__
    weight = jnp.full((1, 1, KH, KW), 0.3, dtype=jnp.float32)
    bias = jnp.full((1,), 0.2, dtype=jnp.float32)

    # Main check: small but non-trivial shape; W = 128 keeps stores lane-dense
    # and tb=2 gives a 2-step grid (exercises megacore sharding on v7x).
    key = jax.random.PRNGKey(0)
    N, H, W = 4, 16, 128
    x = jax.random.normal(key, (N, 1, H, W), dtype=jnp.float32)

    y = jax.block_until_ready(model_forward(x, weight, bias, tb=2))
    y_ref = _reference(x, weight, bias)
    assert y.shape == (N, H * W), y.shape
    assert jnp.allclose(y, y_ref, atol=1e-5, rtol=1e-5)

    # Also check the module's shipped tiny input: x = ones((1, 1, 3, 3)).
    x_small = jnp.ones((1, 1, 3, 3), dtype=jnp.float32)
    y_small = jax.block_until_ready(model_forward(x_small, weight, bias))
    assert y_small.shape == (1, 9), y_small.shape
    assert jnp.allclose(y_small, _reference(x_small, weight, bias),
                        atol=1e-5, rtol=1e-5)

    print("KERNEL_OK")
</pallas_src>

<mosaic_0001>
module attributes {stable_mosaic.version = 11 : i64} {
  func.func @conv3x3_kernel(%arg0: i32, %arg1: memref<2x16x128xf32, #tpu.memory_space<vmem>>, %arg2: memref<3x3xf32, #tpu.memory_space<smem>>, %arg3: memref<1xf32, #tpu.memory_space<smem>>, %arg4: memref<2x16x128xf32, #tpu.memory_space<vmem>>, %arg5: memref<2x18x130xf32, #tpu.memory_space<vmem>>) attributes {dimension_semantics = [#tpu.dimension_semantics<parallel>], iteration_bounds = array<i64: 2>, scalar_prefetch = 0 : i64, scratch_operands = 1 : i64, tpu.core_type = #tpu.core_type<tc>, window_params = [{transform_indices = @transform_0, window_bounds = array<i64: 2, 16, 128>}, {transform_indices = @transform_1, window_bounds = array<i64: 3, 3>}, {transform_indices = @transform_2, window_bounds = array<i64: 1>}, {transform_indices = @transform_3, window_bounds = array<i64: 2, 16, 128>}]} {
    %cst = arith.constant 0.000000e+00 : f32
    %0 = vector.broadcast %cst : f32 to vector<2x18x130xf32>
    %c0 = arith.constant 0 : index
    %c0_0 = arith.constant 0 : index
    %c0_1 = arith.constant 0 : index
    %1 = vector.load %arg5[%c0, %c0_0, %c0_1] : memref<2x18x130xf32, #tpu.memory_space<vmem>>, vector<2x18x130xf32>
    tpu.vector_store %arg5[%c0, %c0_0, %c0_1], %0 {strides = array<i32>} : memref<2x18x130xf32, #tpu.memory_space<vmem>>, vector<2x18x130xf32>,
    %c0_2 = arith.constant 0 : index
    %c0_3 = arith.constant 0 : index
    %c0_4 = arith.constant 0 : index
    %2 = vector.load %arg1[%c0_2, %c0_3, %c0_4] : memref<2x16x128xf32, #tpu.memory_space<vmem>>, vector<2x16x128xf32>
    %c0_5 = arith.constant 0 : index
    %c1 = arith.constant 1 : index
    %c1_6 = arith.constant 1 : index
    %3 = vector.load %arg5[%c0_5, %c1, %c1_6] : memref<2x18x130xf32, #tpu.memory_space<vmem>>, vector<2x16x128xf32>
    tpu.vector_store %arg5[%c0_5, %c1, %c1_6], %2 {strides = array<i32>} : memref<2x18x130xf32, #tpu.memory_space<vmem>>, vector<2x16x128xf32>,
    %c0_7 = arith.constant 0 : index
    %4 = memref.load %arg3[%c0_7] : memref<1xf32, #tpu.memory_space<smem>>
    %5 = vector.broadcast %4 : f32 to vector<2x16x128xf32>
    %c0_8 = arith.constant 0 : index
    %c0_9 = arith.constant 0 : index
    %c0_10 = arith.constant 0 : index
    %6 = vector.load %arg5[%c0_8, %c0_9, %c0_10] : memref<2x18x130xf32, #tpu.memory_space<vmem>>, vector<2x18x128xf32>
    %c0_11 = arith.constant 0 : index
    %c0_12 = arith.constant 0 : index
    %7 = memref.load %arg2[%c0_11, %c0_12] : memref<3x3xf32, #tpu.memory_space<smem>>
    %8 = vector.extract_strided_slice %6 {offsets = [0, 0, 0], sizes = [2, 16, 128], strides = [1, 1, 1]} : vector<2x18x128xf32> to vector<2x16x128xf32>
    %9 = vector.broadcast %7 : f32 to vector<2x16x128xf32>
    %10 = arith.mulf %9, %8 : vector<2x16x128xf32>
    %11 = arith.addf %5, %10 : vector<2x16x128xf32>
    %c1_13 = arith.constant 1 : index
    %c0_14 = arith.constant 0 : index
    %12 = memref.load %arg2[%c1_13, %c0_14] : memref<3x3xf32, #tpu.memory_space<smem>>
    %13 = vector.extract_strided_slice %6 {offsets = [0, 1, 0], sizes = [2, 16, 128], strides = [1, 1, 1]} : vector<2x18x128xf32> to vector<2x16x128xf32>
    %14 = vector.broadcast %12 : f32 to vector<2x16x128xf32>
    %15 = arith.mulf %14, %13 : vector<2x16x128xf32>
    %16 = arith.addf %11, %15 : vector<2x16x128xf32>
    %c2 = arith.constant 2 : index
    %c0_15 = arith.constant 0 : index
    %17 = memref.load %arg2[%c2, %c0_15] : memref<3x3xf32, #tpu.memory_space<smem>>
    %18 = vector.extract_strided_slice %6 {offsets = [0, 2, 0], sizes = [2, 16, 128], strides = [1, 1, 1]} : vector<2x18x128xf32> to vector<2x16x128xf32>
    %19 = vector.broadcast %17 : f32 to vector<2x16x128xf32>
    %20 = arith.mulf %19, %18 : vector<2x16x128xf32>
    %21 = arith.addf %16, %20 : vector<2x16x128xf32>
    %c0_16 = arith.constant 0 : index
    %c0_17 = arith.constant 0 : index
    %c1_18 = arith.constant 1 : index
    %22 = vector.load %arg5[%c0_16, %c0_17, %c1_18] : memref<2x18x130xf32, #tpu.memory_space<vmem>>, vector<2x18x128xf32>
    %c0_19 = arith.constant 0 : index
    %c1_20 = arith.constant 1 : index
    %23 = memref.load %arg2[%c0_19, %c1_20] : memref<3x3xf32, #tpu.memory_space<smem>>
    %24 = vector.extract_strided_slice %22 {offsets = [0, 0, 0], sizes = [2, 16, 128], strides = [1, 1, 1]} : vector<2x18x128xf32> to vector<2x16x128xf32>
    %25 = vector.broadcast %23 : f32 to vector<2x16x128xf32>
    %26 = arith.mulf %25, %24 : vector<2x16x128xf32>
    %27 = arith.addf %21, %26 : vector<2x16x128xf32>
    %c1_21 = arith.constant 1 : index
    %c1_22 = arith.constant 1 : index
    %28 = memref.load %arg2[%c1_21, %c1_22] : memref<3x3xf32, #tpu.memory_space<smem>>
    %29 = vector.extract_strided_slice %22 {offsets = [0, 1, 0], sizes = [2, 16, 128], strides = [1, 1, 1]} : vector<2x18x128xf32> to vector<2x16x128xf32>
    %30 = vector.broadcast %28 : f32 to vector<2x16x128xf32>
    %31 = arith.mulf %30, %29 : vector<2x16x128xf32>
    %32 = arith.addf %27, %31 : vector<2x16x128xf32>
    %c2_23 = arith.constant 2 : index
    %c1_24 = arith.constant 1 : index
    %33 = memref.load %arg2[%c2_23, %c1_24] : memref<3x3xf32, #tpu.memory_space<smem>>
    %34 = vector.extract_strided_slice %22 {offsets = [0, 2, 0], sizes = [2, 16, 128], strides = [1, 1, 1]} : vector<2x18x128xf32> to vector<2x16x128xf32>
    %35 = vector.broadcast %33 : f32 to vector<2x16x128xf32>
    %36 = arith.mulf %35, %34 : vector<2x16x128xf32>
    %37 = arith.addf %32, %36 : vector<2x16x128xf32>
    %c0_25 = arith.constant 0 : index
    %c0_26 = arith.constant 0 : index
    %c2_27 = arith.constant 2 : index
    %38 = vector.load %arg5[%c0_25, %c0_26, %c2_27] : memref<2x18x130xf32, #tpu.memory_space<vmem>>, vector<2x18x128xf32>
    %c0_28 = arith.constant 0 : index
    %c2_29 = arith.constant 2 : index
    %39 = memref.load %arg2[%c0_28, %c2_29] : memref<3x3xf32, #tpu.memory_space<smem>>
    %40 = vector.extract_strided_slice %38 {offsets = [0, 0, 0], sizes = [2, 16, 128], strides = [1, 1, 1]} : vector<2x18x128xf32> to vector<2x16x128xf32>
    %41 = vector.broadcast %39 : f32 to vector<2x16x128xf32>
    %42 = arith.mulf %41, %40 : vector<2x16x128xf32>
    %43 = arith.addf %37, %42 : vector<2x16x128xf32>
    %c1_30 = arith.constant 1 : index
    %c2_31 = arith.constant 2 : index
    %44 = memref.load %arg2[%c1_30, %c2_31] : memref<3x3xf32, #tpu.memory_space<smem>>
    %45 = vector.extract_strided_slice %38 {offsets = [0, 1, 0], sizes = [2, 16, 128], strides = [1, 1, 1]} : vector<2x18x128xf32> to vector<2x16x128xf32>
    %46 = vector.broadcast %44 : f32 to vector<2x16x128xf32>
    %47 = arith.mulf %46, %45 : vector<2x16x128xf32>
    %48 = arith.addf %43, %47 : vector<2x16x128xf32>
    %c2_32 = arith.constant 2 : index
    %c2_33 = arith.constant 2 : index
    %49 = memref.load %arg2[%c2_32, %c2_33] : memref<3x3xf32, #tpu.memory_space<smem>>
    %50 = vector.extract_strided_slice %38 {offsets = [0, 2, 0], sizes = [2, 16, 128], strides = [1, 1, 1]} : vector<2x18x128xf32> to vector<2x16x128xf32>
    %51 = vector.broadcast %49 : f32 to vector<2x16x128xf32>
    %52 = arith.mulf %51, %50 : vector<2x16x128xf32>
    %53 = arith.addf %48, %52 : vector<2x16x128xf32>
    %c0_34 = arith.constant 0 : index
    %c0_35 = arith.constant 0 : index
    %c0_36 = arith.constant 0 : index
    %54 = vector.load %arg4[%c0_34, %c0_35, %c0_36] : memref<2x16x128xf32, #tpu.memory_space<vmem>>, vector<2x16x128xf32>
    tpu.vector_store %arg4[%c0_34, %c0_35, %c0_36], %53 {strides = array<i32>} : memref<2x16x128xf32, #tpu.memory_space<vmem>>, vector<2x16x128xf32>,
    return
  }
  func.func @transform_0(%arg0: i32) -> (i32, i32, i32) {
    %c0_i32 = arith.constant 0 : i32
    %c0_i32_0 = arith.constant 0 : i32
    %c0_i32_1 = arith.constant 0 : i32
    return %arg0, %c0_i32, %c0_i32_0 : i32, i32, i32
  }
  func.func @transform_1(%arg0: i32) -> (i32, i32) {
    %c0_i32 = arith.constant 0 : i32
    %c0_i32_0 = arith.constant 0 : i32
    %c0_i32_1 = arith.constant 0 : i32
    return %c0_i32, %c0_i32_0 : i32, i32
  }
  func.func @transform_2(%arg0: i32) -> i32 {
    %c0_i32 = arith.constant 0 : i32
    %c0_i32_0 = arith.constant 0 : i32
    return %c0_i32 : i32
  }
  func.func @transform_3(%arg0: i32) -> (i32, i32, i32) {
    %c0_i32 = arith.constant 0 : i32
    %c0_i32_0 = arith.constant 0 : i32
    %c0_i32_1 = arith.constant 0 : i32
    return %arg0, %c0_i32, %c0_i32_0 : i32, i32, i32
  }
}

</mosaic_0001>

<bundles_post_ra>
// kernel: tpu_custom_call.1
= control target key start
LH: loop header
LB: loop body
LE: loop exit
PB: predicated region body
PF: predicated region fallthrough
CT: control target
= control target key end

     0   :  { %s1628_s0 = inlined_call_operand.hbm [shape: f32[4,16,128], index: 0, kind: input, shape index: {}]   ;;  %s1629_s1 = inlined_call_operand.hbm [shape: f32[3,3], index: 1, kind: input, shape index: {}]   ;;  %s1630_s2 = inlined_call_operand.<no memory space> [shape: f32[1], index: 2, kind: input, shape index: {}]   ;;  %s1631_s3 = inlined_call_operand.hbm [shape: f32[4,16,128], index: 3, kind: output, shape index: {}]  }
   0x1   :  { %8 = sst [smem:[#allocation3]] %s1630_s2 }
   0x2   :  { %9 = vsyncpa [#allocation5], 0 }
   0x3   :  { %11 = vsyncpa [#allocation5 + $0x1], 0 }
   0x4   :  { %12 = vsyncpa [#allocation7], 0 }
   0x5   :  { %13 = vsyncpa [#allocation6], 0 }
   0x6   :  { %15 = vsyncpa [#allocation6 + $0x1], 0  ;;  %s1098_s14 = smov 0   ;;  %s1100_s15 = smov 0  }
   0x7   :  { %s1102_s16 = smov 0   ;;  %s1104_s17 = smov 0  }
   0x8 LB: > { %s1119_s2 = sadd.s32 4294967295, %s1062_s17   ;;  %s860_s18 = sadd.s32 4294967294, %s1062_s17   ;;  %s1062_s17 = sphi %s1104_s17, %s1653_s17   ;;  %s1058_s16 = sphi %s1102_s16, %s1652_s16   ;;  %s1054_s15 = sphi %s1100_s15, %s1651_s15   ;;  %s1050_s14 = sphi %s1098_s14, %s1650_s14  }
   0x9   : > { %s1123_s19 = sadd.s32 1, %s1062_s17   ;;  %s28_s20 = sadd.s32 1, %s1058_s16 }
   0xa   : > { %s25_s21 = ssub.s32 %s1062_s17, %s1123_s19  ;;  %p35_p0 = scmp.ne.s32.totalorder %s1058_s16, %s1054_s15 }
   0xb   : > { %p26_p1 = scmp.eq.s32.totalorder %s25_s21, 0  ;;  %p36_p2 = scmp.eq.s32.totalorder %s1062_s17, 0 }
   0xc   : > { %p41_p3 = scmp.ne.s32.totalorder %s1054_s15, %s1050_s14  ;;  %p1632_p4 = scmp.eq.s32.totalorder %s1119_s2, 0 }
   0xd   : > { %s1135_s22 = scalar_select %p26_p1, %s1058_s16, %s28_s20  }
   0xe   : > { %p1137_p5 = por %p36_p2, %p35_p0  ;;  %p1143_p6 = por %p1632_p4, %p41_p3 }
   0xf   : > { %p107_p7 = scmp.eq.s32.totalorder %s1119_s2, 1  ;;  %p113_p8 = scmp.eq.s32.totalorder %s860_s18, 1 }
  0x10   : > { %s1637_s24 = scalar_select %p1143_p6, 1, 0 }
  0x11   : > { %p861_p9 = scmp.ge.s32.totalorder %s1062_s17, 1  ;;  %p120_p10 = scmp.lt.s32.totalorder %s1062_s17, 3 }
  0x12   : > { %p1150_p11 = por %p107_p7, %p35_p0  ;;  %p1154_p12 = por %p113_p8, %p41_p3 }
  0x13   : > { %p1158_p13 = pnand %p861_p9, %p120_p10  ;;  %p911_p4 = scmp.lt.s32.totalorder %s1062_s17, 2 }
  0x14   : > { %s1638_s25 = scalar_select %p1150_p11, 1, 0 }
  0x15   : > { %s1639_s26 = scalar_select %p1154_p12, 1, 0 }
  0x16   : > { %s1640_s27 = scalar_select %p1158_p13, 1, 0 }
  0x17   : > { %p898_p2 = pneg %p1158_p13  ;;  %s145_s28 = sand.u32 1, %s1058_s16  }
  0x18   : > { %s887_s29 = sshll.u32 %s1062_s17, 9  ;;  %p1641_p6 = scmp.eq.s32.totalorder %s1119_s2, 0 }
  0x19   : > { %p1172_p7 = pnand %p911_p4, %p1137_p5  ;;  %s864_s4 = sshll.u32 %s145_s28, 5 }
  0x1a   : > { %p899_p0 = pnand %p898_p2, %p1641_p6  ;;  %s1064_s5 = smov [#allocation8]  }
  0x1b   : > { %s1182_s10 = scalar_lea.hbm %s1628_s0, %s887_s29  ;;  %s149_s11 = scalar_lea.vmem [#allocation4], %s864_s4 }
  0x1c   : > { %901 = dma.hbm_to_smem (!%p899_p0), %s1629_s1, 64, %s1064_s5, [#allocation7]  }
  0x1d   : > { %s157_s12 = sshll.u32 %s149_s11, 4  ;;  %s1186_s13 = scalar_lea.sflag [#allocation5], %s145_s28  ;;  %s1184_s12 = int_to_ptr.vmem [resolvable:$true] %s157_s12 }
  0x1e   : > { %s966_s18 = scalar_lea.hbm %s1182_s10, 512  ;;  %p968_p4 = pneg %p1172_p7 }
  0x1f   : > { %p967_p3 = scmp.ne.s32.totalorder %s1182_s10, %s966_s18  ;;  %s971_s23 = scalar_lea.hbm %s1628_s0, 1024 }
  0x20   : > { %p972_p8 = scmp.lt.s32.totalorder %s1182_s10, %s1628_s0  ;;  %p973_p9 = scmp.lt.s32.totalorder %s971_s23, %s966_s18 }
  0x21   : > { %p969_p5 = pnand %p968_p4, %p967_p3 }
  0x22   : > { %p974_p10 = por %p973_p9, %p972_p8 }
  0x23   : > { %p970_p6 = pneg %p969_p5 }
  0x25   : > { %p975_p2 = pnand %p974_p10, %p970_p6 }
  0x27   : > { %978 = shalt.err (!%p975_p2)
}
  0x28   : > { %s979_s28 = scalar_lea.vmem %s1184_s12, 512  ;;  %s1065_s4 = smov [#allocation4]  }
  0x29   : > { %p980_p0 = scmp.ne.s32.totalorder %s1184_s12, %s979_s28  ;;  %s984_s6 = sshll.u32 %s1065_s4, 4  ;;  %s985_s6 = int_to_ptr.vmem [resolvable:$false] %s984_s6 }
  0x2a   : > { %s986_s7 = scalar_lea.vmem %s985_s6, 1024  ;;  %p987_p5 = scmp.lt.s32.totalorder %s1184_s12, %s985_s6 }
  0x2b   : > { %p982_p1 = pnand %p980_p0, %p968_p4  ;;  %p988_p12 = scmp.lt.s32.totalorder %s986_s7, %s979_s28 }
  0x2d   : > { %p983_p3 = pneg %p982_p1  ;;  %p989_p11 = por %p988_p12, %p987_p5 }
  0x2f   : > { %p990_p13 = pnand %p989_p11, %p983_p3 }
  0x31   : > { %993 = shalt.err (!%p990_p13)
}
  0x32   : > { %s1066_s8 = smov 128   ;;  %s1067_s9 = smov 8  }
  0x33   : > { %905 = dma.hbm_to_vmem [thread:$0]  (!%p1172_p7), %s1182_s10, 512, %s1184_s12, %s1186_s13, %s1066_s8, %s1066_s8, %s1067_s9  }
  0x34   : > { %p1643_p4 = scmp.ne.s32.totalorder %s1640_s27, 0 }
  0x35   : > { %s1210_s11 = sand.u32 (!%p1643_p4), 1, %s1054_s15   ;;  %p1644_p11 = scmp.ne.s32.totalorder (!%p1643_p4), %s1637_s24, 0 }
  0x36   : > { %169 = sbr.rel (%p1643_p4) target bundleno = 421 (0x1a5), region = 32  ;;  %s869_s18 = sshll.u32 (!%p1643_p4), %s1210_s11, 5 }
  0x37   : > { %s172_s20 = scalar_lea.sflag (!%p1643_p4), [#allocation5], %s1210_s11  ;;  %s175_s21 = scalar_lea.vmem (!%p1643_p4), [#allocation4], %s869_s18 }
  0x3b   : > { %1037 = dma.done.wait (%p1644_p11), %s172_s20, 512  }
  0x3c   : > { %1039 = vsyncadd (%p1644_p11), %s172_s20, 4294966784  ;;  %p1645_p12 = scmp.eq.s32.totalorder %s1119_s2, 0 }
  0x3e   : > { %1041 = dma.done.wait (%p1645_p12), [#allocation7], 64   ;;  %p1646_p13 = pmov %p1645_p12 }
  0x40   : > { %1043 = vsyncadd (%p1646_p13), [#allocation7], 4294967232 }
  0x41   : > { %184 = sfence }
  0x42   : > { %v220_v0 = vld [vmem:[%s175_s21 + $0x8] sm:$0xff]  ;;  %v219_v1 = vld [vmem:[%s175_s21] sm:$0xff]  ;;  %v221_v2 = vld [vmem:[%s175_s21 + $0x10] sm:$0xff]  ;;  %vm227_vm0 = vcmask 1040384   ;;  %vm211_vm1 = vcmask 9216   ;;  %s1068_s27 = smov 1  }
  0x43   : > { %v229_v3 = vrot.slane %v220_v0, 7  ;;  %v228_v4 = vrot.slane %v219_v1, 7  ;;  %v222_v5 = vld [vmem:[%s175_s21 + $0x18] sm:$0xff]  ;;  %v231_v6 = vrot.slane %v221_v2, 7  ;;  %v1069_v7 = vmov 0.0   ;;  %s874_s24 = sld [smem:[#allocation8 + $0x1]] }
  0x44   : > { %210 = vst [vmem:[#allocation2 + $0x20] sm:$0x3] %v1069_v7  ;;  %212 = vst.msk [vmem:[#allocation2 + $0x28] sm:$0x3] %vm211_vm1, %v1069_v7  ;;  %vm206_vm2 = vcmask 15360   ;;  %v232_v9 = vrot.slane %v222_v5, 7 }
  0x45   : > { %238 = vrot.lane.b32.xlu1 %v229_v3, %s1068_s27  ;;  %234 = vrot.lane.b32.xlu0 %v228_v4, %s1068_s27  ;;  %205 = vst [vmem:[#allocation2] sm:$0xff] %v1069_v7  ;;  %208 = vst [vmem:[#allocation2 + $0x10] sm:$0xff] %v1069_v7  ;;  %v230_v8 = vsel %vm227_vm0, %v228_v4, %v229_v3  ;;  %vm260_vm3 = vcmask 1040392   ;;  %vm262_vm4 = vcmask 0   ;;  %vm252_vm5 = vcmask 1047561   ;;  %s877_s30 = sld [smem:[#allocation8 + $0x2]] }
  0x46   : > { %213 = vst [vmem:[#allocation2 + $0x30] sm:$0xff] %v1069_v7  ;;  %215 = vst [vmem:[#allocation2 + $0x40] sm:$0xff] %v1069_v7  ;;  %v233_v10 = vsel %vm227_vm0, %v231_v6, %v232_v9  ;;  %vm254_vm6 = vcmask 7169   ;;  %vm256_vm7 = vcmask 1047560   ;;  %vm258_vm8 = vcmask 7168   ;;  %s1070_s10 = smov 127  }
  0x47   : > { %217 = vst [vmem:[#allocation2 + $0x50] sm:$0x3] %v1069_v7  ;;  %218 = vst.msk [vmem:[#allocation2 + $0x58] sm:$0x3] %vm211_vm1, %v1069_v7  ;;  %s1071_s12 = smov 126   ;;  %s875_s13 = sld [smem:[#allocation8 + $0x81]] }
  0x48   : > { %207 = vst.msk [vmem:[#allocation2 + $0x8] sm:$0xff] %vm206_vm2, %v1069_v7  ;;  %209 = vst.msk [vmem:[#allocation2 + $0x18] sm:$0xff] %vm206_vm2, %v1069_v7  ;;  %s876_s23 = sld [smem:[#allocation8 + $0x101]]  ;;  %vm302_vm9 = vcmask 1046528   ;;  %vm335_vm10 = vcmask 1045504   ;;  %vm400_vm11 = vcmask 1039360  }
  0x49   : > { %214 = vst.msk [vmem:[#allocation2 + $0x38] sm:$0xff] %vm206_vm2, %v1069_v7  ;;  %216 = vst.msk [vmem:[#allocation2 + $0x48] sm:$0xff] %vm206_vm2, %v1069_v7  ;;  %240 = vrot.lane.b32.xlu1 %v231_v6, %s1068_s27  ;;  %236 = vrot.lane.b32.xlu0 %v230_v8, %s1068_s27  ;;  %v367_v15 = vstv %s874_s24  ;;  %s879_s29 = sld [smem:[#allocation8 + $0x102]]  ;;  %vm595_vm12 = vcmask 1031168   ;;  %s202_s8 = scalar_lea.vmem [#allocation9], %s869_s18 }
  0x4a   : > { %s278_s5 = sld [smem:[#allocation8]]  ;;  %s775_s9 = sshll.u32 %s202_s8, 4  ;;  %s1579_s9 = int_to_ptr.vmem [resolvable:$true] %s775_s9 }
  0x4b   : > { %v1244_v26 = vstv %s877_s30  ;;  %s872_s28 = sld [smem:[#allocation8 + $0x80]]  ;;  %s889_s18 = sshll.u32 %s1119_s2, 9 }
  0x4c   : > { %s270_s4 = sld [smem:[#allocation3]]  ;;  %s761_s24 = scalar_lea.sflag [#allocation6], %s1210_s11 }
  0x4d   : > { %242 = vrot.lane.b32.xlu0 %v233_v10, %s1068_s27  ;;  %244 = vrot.lane.b32.xlu1 %v232_v9, %s1068_s27  ;;  %s873_s6 = sld [smem:[#allocation8 + $0x100]]  ;;  %v414_v39 = vstv %s875_s13  ;;  %s1585_s27 = scalar_lea.hbm %s1631_s3, %s889_s18 }
  0x4e   : > { %v1279_v43 = vstv %s876_s23  ;;  %s878_s7 = sld [smem:[#allocation8 + $0x82]]  ;;  %s994_s2 = scalar_lea.vmem %s1579_s9, 512 }
  0x4f   : > { %v1285_v46 = vstv %s879_s29  ;;  %p995_p1 = scmp.ne.s32.totalorder %s1579_s9, %s994_s2  ;;  %p1647_p7 = scmp.ne.s32.totalorder %s1638_s25, 0 }
  0x50   : > { %v1287_v47 = vstv %s278_s5  ;;  %s1072_s30 = smov [#allocation9]  }
  0x51   : > { %v1292_v51 = vstv %s872_s28  ;;  %p996_p6 = pnand %p995_p1, %p1647_p7 }
  0x52   : > { %v1298_v54 = vstv %s270_s4 }
  0x53   : > { %v1300_v55 = vstv %s873_s6  ;;  %p997_p8 = pneg %p996_p6 }
  0xb7   : > { %v239_v11 = vpop.permute.xlu1 %238  ;;  %v235_v12 = vpop.permute.xlu0 %234 }
  0xb8   : > { %261 = vst.msk [vmem:[#allocation2 + $0x20] sm:$0x1] %vm260_vm3, %v239_v11 }
  0xb9   : > { %263 = vst.msk [vmem:[#allocation2 + $0x28] sm:$0x1] %vm262_vm4, %v239_v11 }
  0xba   : > { %253 = vst.msk [vmem:[#allocation2] sm:$0xfe] %vm252_vm5, %v235_v12 }
  0xbb   : > { %255 = vst.msk [vmem:[#allocation2 + $0x8] sm:$0xfe] %vm254_vm6, %v235_v12  ;;  %v241_v13 = vpop.permute.xlu1 %240  ;;  %v237_v14 = vpop.permute.xlu0 %236 }
  0xbc   : > { %264 = vst.msk [vmem:[#allocation2 + $0x30] sm:$0xfe] %vm252_vm5, %v241_v13 }
  0xbd   : > { %265 = vst.msk [vmem:[#allocation2 + $0x38] sm:$0xfe] %vm254_vm6, %v241_v13 }
  0xbe   : > { %257 = vst.msk [vmem:[#allocation2 + $0x10] sm:$0xff] %vm256_vm7, %v237_v14 }
  0xbf   : > { %259 = vst.msk [vmem:[#allocation2 + $0x18] sm:$0xff] %vm258_vm8, %v237_v14  ;;  %v243_v16 = vpop.permute.xlu0 %242  ;;  %v245_v19 = vpop.permute.xlu1 %244  ;;  %v1276_v41 = vld [vmem:[#allocation2 + $0x20] sm:$0x3] }
  0xc0   : > { %266 = vst.msk [vmem:[#allocation2 + $0x40] sm:$0xff] %vm256_vm7, %v243_v16  ;;  %v1274_v40 = vld [vmem:[#allocation2 + $0x28] sm:$0x3]  ;;  %v419_v50 = vmul.f32 %v414_v39, %v1276_v41 }
  0xc1   : > { %v1230_v18 = vld [vmem:[#allocation2] sm:$0xff]  ;;  %267 = vst.msk [vmem:[#allocation2 + $0x48] sm:$0xff] %vm258_vm8, %v243_v16  ;;  %v420_v49 = vmul.f32 %v414_v39, %v1274_v40  ;;  %v1312_v59 = vmul.f32 %v1279_v43, %v1274_v40 }
  0xc2   : > { %v1228_v17 = vld [vmem:[#allocation2 + $0x8] sm:$0xff]  ;;  %v368_v21 = vmul.f32 %v367_v15, %v1230_v18  ;;  %268 = vst.msk [vmem:[#allocation2 + $0x50] sm:$0x1] %vm260_vm3, %v245_v19  ;;  %v563_v28 = vmul.f32 %v1244_v26, %v1230_v18  ;;  %v415_v45 = vmul.f32 %v414_v39, %v1230_v18  ;;  %v1308_v58 = vmul.f32 %v1279_v43, %v1230_v18 }
  0xc3   : > { %v369_v20 = vmul.f32 %v367_v15, %v1228_v17  ;;  %269 = vst.msk [vmem:[#allocation2 + $0x58] sm:$0x1] %vm262_vm4, %v245_v19  ;;  %v1240_v23 = vld [vmem:[#allocation2 + $0x30] sm:$0xff]  ;;  %v564_v27 = vmul.f32 %v1244_v26, %v1228_v17  ;;  %v416_v42 = vmul.f32 %v414_v39, %v1228_v17  ;;  %v1304_v57 = vmul.f32 %v1279_v43, %v1228_v17 }
  0xc4   : > { %384 = vrot.lane.b32.xlu0 %v368_v21, %s1070_s10  ;;  %v1238_v22 = vld [vmem:[#allocation2 + $0x38] sm:$0xff]  ;;  %v372_v25 = vmul.f32 %v367_v15, %v1240_v23  ;;  %v567_v30 = vmul.f32 %v1244_v26, %v1240_v23  ;;  %v439_v61 = vrot.slane %v415_v45, 1  ;;  %v421_v63 = vmul.f32 %v414_v39, %v1240_v23 }
  0xc5   : > { %386 = vrot.lane.b32.xlu1 %v369_v20, %s1070_s10  ;;  %v373_v24 = vmul.f32 %v367_v15, %v1238_v22  ;;  %v568_v29 = vmul.f32 %v1244_v26, %v1238_v22  ;;  %v1260_v32 = vld [vmem:[#allocation2 + $0x10] sm:$0xff]  ;;  %v442_v56 = vrot.slane %v416_v42, 1  ;;  %v422_v62 = vmul.f32 %v414_v39, %v1238_v22 }
  0xc6   : > { %v1258_v31 = vld [vmem:[#allocation2 + $0x18] sm:$0xff]  ;;  %v370_v34 = vmul.f32 %v367_v15, %v1260_v32  ;;  %v417_v48 = vmul.f32 %v414_v39, %v1260_v32  ;;  %v565_v53 = vmul.f32 %v1244_v26, %v1260_v32  ;;  %v447_v3 = vrot.slane %v420_v49, 1 }
  0xc7   : > { %v371_v33 = vmul.f32 %v367_v15, %v1258_v31  ;;  %v1268_v36 = vld [vmem:[#allocation2 + $0x40] sm:$0xff]  ;;  %v418_v44 = vmul.f32 %v414_v39, %v1258_v31  ;;  %v566_v52 = vmul.f32 %v1244_v26, %v1258_v31  ;;  %v445_v4 = vrot.slane %v419_v50, 1 }
  0xc8   : > { %392 = vrot.lane.b32.xlu0 %v372_v25, %s1070_s10  ;;  %v1266_v35 = vld [vmem:[#allocation2 + $0x48] sm:$0xff]  ;;  %v374_v38 = vmul.f32 %v367_v15, %v1268_v36  ;;  %v440_v2 = vrot.slane %v417_v48, 1  ;;  %v1324_v5 = vmul.f32 %v1279_v43, %v1258_v31  ;;  %v569_v7 = vmul.f32 %v1244_v26, %v1268_v36 }
  0xc9   : > { %394 = vrot.lane.b32.xlu1 %v373_v24, %s1070_s10  ;;  %v375_v37 = vmul.f32 %v367_v15, %v1266_v35  ;;  %v443_v60 = vrot.slane %v418_v44, 1  ;;  %v1320_v1 = vld [vmem:[#allocation2 + $0x50] sm:$0x3]  ;;  %v570_v6 = vmul.f32 %v1244_v26, %v1266_v35  ;;  %v424_v8 = vmul.f32 %v414_v39, %v1266_v35 }
  0xca   : > { %v1318_v0 = vld [vmem:[#allocation2 + $0x58] sm:$0x3]  ;;  %v1332_v9 = vmul.f32 %v414_v39, %v1268_v36  ;;  %v1336_v11 = vmul.f32 %v414_v39, %v1320_v1  ;;  %v516_v12 = vrot.slane %v1304_v57, 2  ;;  %v1341_v13 = vmul.f32 %v1279_v43, %v1260_v32 }
  0xcb   : > { %v426_v10 = vmul.f32 %v414_v39, %v1318_v0  ;;  %v444_v14 = vsel %vm302_vm9, %v442_v56, %v443_v60  ;;  %v452_v15 = vrot.slane %v422_v62, 1  ;;  %v449_v16 = vrot.slane %v421_v63, 1 }
  0xcc   : > { %579 = vrot.lane.b32.xlu0 %v563_v28, %s1071_s12  ;;  %v691_v19 = vmul.f32 %v1285_v46, %v1238_v22  ;;  %v441_v20 = vsel %vm302_vm9, %v439_v61, %v440_v2  ;;  %v448_v21 = vsel %vm302_vm9, %v443_v60, %v447_v3  ;;  %v1352_v24 = vmul.f32 %v1285_v46, %v1266_v35 }
  0xcd   : > { %581 = vrot.lane.b32.xlu1 %v564_v27, %s1071_s12  ;;  %v690_v25 = vmul.f32 %v1285_v46, %v1240_v23  ;;  %v446_v26 = vsel %vm302_vm9, %v440_v2, %v445_v4  ;;  %v453_v27 = vrot.slane %v424_v8, 1  ;;  %v450_v28 = vrot.slane %v1332_v9, 1 }
  0xce   : > { %v291_v44 = vmul.f32 %v1260_v32, %v1292_v51  ;;  %v514_v45 = vrot.slane %v1341_v13, 2  ;;  %v324_v49 = vmul.f32 %v1260_v32, %v1300_v55  ;;  %v280_v50 = vmul.f32 %v1230_v18, %v1287_v47 }
  0xcf   : > { %v718_v39 = vrot.slane %v690_v25, 2  ;;  %v290_v60 = vmul.f32 %v1230_v18, %v1292_v51  ;;  %v451_v61 = vsel %vm302_vm9, %v449_v16, %v450_v28  ;;  %v323_v2 = vmul.f32 %v1230_v18, %v1300_v55 }
  0xd0   : > { %587 = vrot.lane.b32.xlu0 %v567_v30, %s1071_s12  ;;  %v457_v30 = vrot.slane %v426_v10, 1  ;;  %v304_v56 = vrot.slane %v291_v44, 1  ;;  %v337_v63 = vrot.slane %v324_v49, 2  ;;  %v284_v3 = vadd.f32 %v280_v50, %v1298_v54 }
  0xd1   : > { %589 = vrot.lane.b32.xlu1 %v568_v29, %s1071_s12  ;;  %v1360_v29 = vmul.f32 %v1285_v46, %v1268_v36  ;;  %v303_v4 = vrot.slane %v290_v60, 1  ;;  %v336_v8 = vrot.slane %v323_v2, 2  ;;  %v294_v9 = vmul.f32 %v1268_v36, %v1292_v51 }
  0xd2   : > { %v458_v62 = vsel %vm302_vm9, %v453_v27, %v457_v30  ;;  %v326_v10 = vmul.f32 %v1240_v23, %v1300_v55  ;;  %v283_v2 = vmul.f32 %v1268_v36, %v1287_v47  ;;  %v521_v57 = vrot.slane %v1312_v59, 2 }
  0xd3   : > { %v719_v42 = vrot.slane %v1360_v29, 2 }
  0xd4   : > { %388 = vrot.lane.b32.xlu0 %v370_v34, %s1070_s10  ;;  %v721_v34 = vrot.slane %v691_v19, 2  ;;  %v341_v30 = vrot.slane %v326_v10, 2 }
  0xd5   : > { %390 = vrot.lane.b32.xlu1 %v371_v33, %s1070_s10  ;;  %v455_v33 = vrot.slane %v1336_v11, 1  ;;  %v327_v11 = vmul.f32 %v1268_v36, %v1300_v55 }
  0xd8   : > { %396 = vrot.lane.b32.xlu0 %v374_v38, %s1070_s10  ;;  %v517_v38 = vrot.slane %v1324_v5, 2 }
  0xd9   : > { %398 = vrot.lane.b32.xlu1 %v375_v37, %s1070_s10  ;;  %v722_v37 = vrot.slane %v1352_v24, 2 }
  0xdb   : > { %v1374_v48 = vsel %vm335_vm10, %v721_v34, %v722_v37  ;;  %v342_v34 = vrot.slane %v327_v11, 2 }
  0xdc   : > { %583 = vrot.lane.b32.xlu0 %v565_v53, %s1071_s12  ;;  %v1384_v53 = vsel %vm335_vm10, %v718_v39, %v719_v42 }
  0xdd   : > { %585 = vrot.lane.b32.xlu1 %v566_v52, %s1071_s12  ;;  %v454_v52 = vsel %vm302_vm9, %v452_v15, %v453_v27  ;;  %v305_v15 = vsel %vm302_vm9, %v303_v4, %v304_v56  ;;  %v309_v27 = vrot.slane %v294_v9, 1 }
  0xde   : > { %v317_v25 = vadd.f32 %v305_v15, %v284_v3  ;;  %v497_v15 = vmul.f32 %v1279_v43, %v1268_v36 }
  0xe0   : > { %591 = vrot.lane.b32.xlu0 %v569_v7, %s1071_s12  ;;  %v293_v7 = vmul.f32 %v1240_v23, %v1292_v51 }
  0xe1   : > { %593 = vrot.lane.b32.xlu1 %v570_v6, %s1071_s12  ;;  %v282_v6 = vmul.f32 %v1240_v23, %v1287_v47 }
  0xe2   : > { %v308_v19 = vrot.slane %v293_v7, 1  ;;  %v456_v7 = vsel %vm302_vm9, %v450_v28, %v455_v33  ;;  %v493_v28 = vmul.f32 %v1279_v43, %v1276_v41 }
  0xe3   : > { %v286_v16 = vadd.f32 %v282_v6, %v1298_v54 }
  0xe4   : > { %459 = vrot.lane.b32.xlu0 %v441_v20, %s1070_s10  ;;  %v281_v20 = vmul.f32 %v1260_v32, %v1287_v47  ;;  %v310_v60 = vsel %vm302_vm9, %v308_v19, %v309_v27  ;;  %v513_v47 = vrot.slane %v1308_v58, 2  ;;  %v518_v58 = vsel %vm335_vm10, %v516_v12, %v517_v38 }
  0xe5   : > { %461 = vrot.lane.b32.xlu1 %v444_v14, %s1070_s10  ;;  %v274_v14 = vld [vmem:[#allocation2 + $0x20] sm:$0x3]  ;;  %v319_v4 = vadd.f32 %v310_v60, %v286_v16 }
  0xe6   : > { %v285_v39 = vadd.f32 %v281_v20, %v1298_v54  ;;  %v292_v44 = vmul.f32 %v1292_v51, %v274_v14  ;;  %v325_v49 = vmul.f32 %v1300_v55, %v274_v14  ;;  %v519_v20 = vrot.slane %v493_v28, 2 }
  0xe8   : > { %463 = vrot.lane.b32.xlu0 %v446_v26, %s1070_s10  ;;  %v338_v26 = vsel %vm335_vm10, %v336_v8, %v337_v63  ;;  %v339_v6 = vrot.slane %v325_v49, 2  ;;  %v287_v8 = vadd.f32 %v283_v2, %v1298_v54  ;;  %v520_v59 = vsel %vm335_vm10, %v514_v45, %v519_v20 }
  0xe9   : > { %465 = vrot.lane.b32.xlu1 %v448_v21, %s1070_s10  ;;  %v277_v21 = vld [vmem:[#allocation2 + $0x50] sm:$0x3]  ;;  %v1415_v50 = vadd.f32 %v338_v26, %v317_v25  ;;  %v495_v25 = vmul.f32 %v1279_v43, %v1240_v23  ;;  %v522_v26 = vsel %vm335_vm10, %v517_v38, %v521_v57  ;;  %v609_v49 = vstv %s878_s7 }
  0xea   : > { %v295_v3 = vmul.f32 %v1292_v51, %v277_v21  ;;  %v328_v10 = vmul.f32 %v1300_v55, %v277_v21  ;;  %v340_v14 = vsel %vm335_vm10, %v337_v63, %v339_v6  ;;  %v498_v63 = vmul.f32 %v1279_v43, %v1266_v35 }
  0xeb   : > { %v496_v21 = vmul.f32 %v1279_v43, %v1238_v22  ;;  %v523_v5 = vrot.slane %v495_v25, 2  ;;  %v613_v60 = vmul.f32 %v609_v49, %v1258_v31 }
  0xec   : > { %467 = vrot.lane.b32.xlu0 %v451_v61, %s1070_s10  ;;  %v306_v61 = vrot.slane %v292_v44, 1  ;;  %v311_v9 = vrot.slane %v295_v3, 1  ;;  %v344_v55 = vrot.slane %v328_v10, 2  ;;  %v612_v3 = vmul.f32 %v609_v49, %v1260_v32 }
  0xed   : > { %469 = vrot.lane.b32.xlu1 %v454_v52, %s1070_s10  ;;  %v343_v52 = vsel %vm335_vm10, %v341_v30, %v342_v34  ;;  %v527_v30 = vrot.slane %v498_v63, 2  ;;  %v526_v44 = vrot.slane %v496_v21, 2  ;;  %v638_v6 = vrot.slane %v613_v60, 1 }
  0xee   : > { %v1428_v11 = vadd.f32 %v343_v52, %v319_v4  ;;  %v307_v51 = vsel %vm302_vm9, %v304_v56, %v306_v61  ;;  %v312_v33 = vsel %vm302_vm9, %v309_v27, %v311_v9  ;;  %v515_v56 = vsel %vm335_vm10, %v513_v47, %v514_v45 }
  0xef   : > { %v318_v54 = vadd.f32 %v307_v51, %v285_v39  ;;  %v345_v19 = vsel %vm335_vm10, %v342_v34, %v344_v55  ;;  %v500_v27 = vmul.f32 %v1279_v43, %v1318_v0  ;;  %v524_v34 = vrot.slane %v497_v15, 2 }
  0xf0   : > { %471 = vrot.lane.b32.xlu0 %v456_v7, %s1070_s10  ;;  %v499_v39 = vmul.f32 %v1279_v43, %v1320_v1  ;;  %v528_v2 = vsel %vm335_vm10, %v526_v44, %v527_v30  ;;  %v611_v43 = vmul.f32 %v609_v49, %v1228_v17  ;;  %v610_v4 = vmul.f32 %v609_v49, %v1230_v18 }
  0xf1   : > { %473 = vrot.lane.b32.xlu1 %v458_v62, %s1070_s10  ;;  %v320_v62 = vadd.f32 %v312_v33, %v287_v8  ;;  %v1447_v16 = vadd.f32 %v340_v14, %v318_v54  ;;  %v531_v38 = vrot.slane %v500_v27, 2  ;;  %v525_v13 = vsel %vm335_vm10, %v523_v5, %v524_v34 }
  0xf2   : > { %v529_v45 = vrot.slane %v499_v39, 2  ;;  %v635_v7 = vrot.slane %v612_v3, 1  ;;  %v637_v8 = vrot.slane %v611_v43, 1  ;;  %v634_v9 = vrot.slane %v610_v4, 1 }
  0xf3   : > { %v1453_v12 = vadd.f32 %v345_v19, %v320_v62  ;;  %v532_v52 = vsel %vm335_vm10, %v527_v30, %v531_v38  ;;  %v615_v10 = vmul.f32 %v609_v49, %v1274_v40  ;;  %v614_v47 = vmul.f32 %v609_v49, %v1276_v41 }
  0xf4   : > { %533 = vrot.lane.b32.xlu0 %v515_v56, %s1070_s10  ;;  %v530_v61 = vsel %vm335_vm10, %v524_v34, %v529_v45  ;;  %v619_v51 = vmul.f32 %v609_v49, %v1266_v35  ;;  %v639_v14 = vsel %vm302_vm9, %v637_v8, %v638_v6  ;;  %v636_v28 = vsel %vm302_vm9, %v634_v9, %v635_v7 }
  0xf5   : > { %535 = vrot.lane.b32.xlu1 %v518_v58, %s1070_s10  ;;  %v618_v54 = vmul.f32 %v609_v49, %v1268_v36  ;;  %v617_v33 = vmul.f32 %v609_v49, %v1238_v22  ;;  %v642_v55 = vrot.slane %v615_v10, 1  ;;  %v640_v58 = vrot.slane %v614_v47, 1 }
  0xf6   : > { %v616_v56 = vmul.f32 %v609_v49, %v1240_v23  ;;  %v648_v62 = vrot.slane %v619_v51, 1  ;;  %v621_v63 = vmul.f32 %v609_v49, %v1318_v0  ;;  %v620_v36 = vmul.f32 %v609_v49, %v1320_v1 }
  0xf7   : > { %v643_v35 = vsel %vm302_vm9, %v638_v6, %v642_v55  ;;  %v641_v15 = vsel %vm302_vm9, %v635_v7, %v640_v58  ;;  %v645_v19 = vrot.slane %v618_v54, 1  ;;  %v647_v57 = vrot.slane %v617_v33, 1 }
  0xf8   : > { %537 = vrot.lane.b32.xlu0 %v520_v59, %s1070_s10  ;;  %v644_v22 = vrot.slane %v616_v56, 1  ;;  %v652_v21 = vrot.slane %v621_v63, 1  ;;  %v650_v25 = vrot.slane %v620_v36, 1  ;;  %v686_v27 = vmul.f32 %v1285_v46, %v1260_v32 }
  0xf9   : > { %539 = vrot.lane.b32.xlu1 %v522_v26, %s1070_s10  ;;  %v649_v20 = vsel %vm302_vm9, %v647_v57, %v648_v62  ;;  %v687_v26 = vmul.f32 %v1285_v46, %v1258_v31  ;;  %v685_v59 = vmul.f32 %v1285_v46, %v1228_v17  ;;  %v684_v30 = vmul.f32 %v1285_v46, %v1230_v18 }
  0xfa   : > { %v646_v23 = vsel %vm302_vm9, %v644_v22, %v645_v19  ;;  %v653_v34 = vsel %vm302_vm9, %v648_v62, %v652_v21  ;;  %v651_v39 = vsel %vm302_vm9, %v645_v19, %v650_v25  ;;  %v709_v5 = vrot.slane %v686_v27, 2 }
  0xfb   : > { %v712_v44 = vrot.slane %v687_v26, 2  ;;  %v711_v31 = vrot.slane %v685_v59, 2  ;;  %v708_v32 = vrot.slane %v684_v30, 2  ;;  %v689_v49 = vmul.f32 %v1285_v46, %v1274_v40 }
  0xfc   : > { %541 = vrot.lane.b32.xlu0 %v525_v13, %s1070_s10  ;;  %v688_v17 = vmul.f32 %v1285_v46, %v1276_v41  ;;  %v695_v40 = vmul.f32 %v1285_v46, %v1318_v0  ;;  %v694_v41 = vmul.f32 %v1285_v46, %v1320_v1 }
  0xfd   : > { %543 = vrot.lane.b32.xlu1 %v528_v2, %s1070_s10  ;;  %v713_v18 = vsel %vm335_vm10, %v711_v31, %v712_v44  ;;  %v710_v38 = vsel %vm335_vm10, %v708_v32, %v709_v5  ;;  %v716_v60 = vrot.slane %v689_v49, 2 }
  0xfe   : > { %v714_v2 = vrot.slane %v688_v17, 2  ;;  %v726_v3 = vrot.slane %v695_v40, 2  ;;  %v724_v43 = vrot.slane %v694_v41, 2 }
  0xff   : > { %v717_v13 = vsel %vm335_vm10, %v712_v44, %v716_v60 }
 0x100   : > { %545 = vrot.lane.b32.xlu0 %v530_v61, %s1070_s10  ;;  %v715_v45 = vsel %vm335_vm10, %v709_v5, %v714_v2  ;;  %v727_v4 = vsel %vm335_vm10, %v722_v37, %v726_v3  ;;  %v725_v46 = vsel %vm335_vm10, %v719_v42, %v724_v43 }
 0x101   : > { %547 = vrot.lane.b32.xlu1 %v532_v52, %s1070_s10  ;;  %s998_s10 = sshll.u32 %s1072_s30, 4  ;;  %s999_s10 = int_to_ptr.vmem [resolvable:$false] %s998_s10 }
 0x102   : > { %p1001_p9 = scmp.lt.s32.totalorder %s1579_s9, %s999_s10 }
 0x104   : > { %654 = vrot.lane.b32.xlu0 %v636_v28, %s1071_s12 }
 0x105   : > { %656 = vrot.lane.b32.xlu1 %v639_v14, %s1071_s12 }
 0x108   : > { %658 = vrot.lane.b32.xlu0 %v641_v15, %s1071_s12 }
 0x109   : > { %660 = vrot.lane.b32.xlu1 %v643_v35, %s1071_s12 }
 0x10c   : > { %662 = vrot.lane.b32.xlu0 %v646_v23, %s1071_s12 }
 0x10d   : > { %664 = vrot.lane.b32.xlu1 %v649_v20, %s1071_s12 }
 0x110   : > { %666 = vrot.lane.b32.xlu0 %v651_v39, %s1071_s12 }
 0x111   : > { %668 = vrot.lane.b32.xlu1 %v653_v34, %s1071_s12 }
 0x114   : > { %728 = vrot.lane.b32.xlu0 %v710_v38, %s1071_s12 }
 0x115   : > { %730 = vrot.lane.b32.xlu1 %v713_v18, %s1071_s12 }
 0x118   : > { %732 = vrot.lane.b32.xlu0 %v715_v45, %s1071_s12 }
 0x119   : > { %734 = vrot.lane.b32.xlu1 %v717_v13, %s1071_s12 }
 0x11c   : > { %736 = vrot.lane.b32.xlu0 %v1384_v53, %s1071_s12 }
 0x11d   : > { %738 = vrot.lane.b32.xlu1 %v1374_v48, %s1071_s12 }
 0x120   : > { %740 = vrot.lane.b32.xlu0 %v725_v46, %s1071_s12 }
 0x121   : > { %742 = vrot.lane.b32.xlu1 %v727_v4, %s1071_s12  ;;  %s1000_s12 = scalar_lea.vmem %s999_s10, 1024 }
 0x122   : > { %p1002_p10 = scmp.lt.s32.totalorder %s1000_s12, %s994_s2 }
 0x124   : > { %p1003_p2 = por %p1002_p10, %p1001_p9 }
 0x126   : > { %p1004_p0 = pnand %p1003_p2, %p997_p8 }
 0x136   : > { %v385_v1 = vpop.permute.xlu0 %384 }
 0x137   : > { %v387_v0 = vpop.permute.xlu1 %386 }
 0x138   : > { %v401_v48 = vsel %vm400_vm11, %v385_v1, %v387_v0 }
 0x139   : > { %v409_v52 = vadd.f32 %v401_v48, %v1415_v50 }
 0x13a   : > { %v393_v61 = vpop.permute.xlu0 %392 }
 0x13b   : > { %v395_v53 = vpop.permute.xlu1 %394 }
 0x13c   : > { %v403_v24 = vsel %vm400_vm11, %v393_v61, %v395_v53 }
 0x13d   : > { %v411_v37 = vadd.f32 %v403_v24, %v1428_v11 }
 0x13e   : > { %v580_v42 = vpop.permute.xlu0 %579 }
 0x13f   : > { %v582_v29 = vpop.permute.xlu1 %581 }
 0x140   : > { %v596_v6 = vsel %vm595_vm12, %v580_v42, %v582_v29 }
 0x142   : > { %v588_v8 = vpop.permute.xlu0 %587 }
 0x143   : > { %v590_v7 = vpop.permute.xlu1 %589 }
 0x144   : > { %v598_v9 = vsel %vm595_vm12, %v588_v8, %v590_v7 }
 0x146   : > { %v389_v47 = vpop.permute.xlu0 %388 }
 0x147   : > { %v391_v10 = vpop.permute.xlu1 %390 }
 0x148   : > { %v402_v60 = vsel %vm400_vm11, %v389_v47, %v391_v10 }
 0x149   : > { %v410_v40 = vadd.f32 %v402_v60, %v1447_v16 }
 0x14a   : > { %v397_v14 = vpop.permute.xlu0 %396 }
 0x14b   : > { %v399_v51 = vpop.permute.xlu1 %398 }
 0x14c   : > { %v404_v1 = vsel %vm400_vm11, %v397_v14, %v399_v51 }
 0x14d   : > { %v412_v29 = vadd.f32 %v404_v1, %v1453_v12 }
 0x14e   : > { %v584_v28 = vpop.permute.xlu0 %583 }
 0x14f   : > { %v586_v50 = vpop.permute.xlu1 %585 }
 0x150   : > { %v597_v61 = vsel %vm595_vm12, %v584_v28, %v586_v50 }
 0x152   : > { %v1551_v33 = vpop.permute.xlu0 %591 }
 0x153   : > { %v1549_v54 = vpop.permute.xlu1 %593 }
 0x156   : > { %v460_v55 = vpop.permute.xlu0 %459 }
 0x157   : > { %v462_v11 = vpop.permute.xlu1 %461 }
 0x158   : > { %v475_v19 = vsel %vm400_vm11, %v460_v55, %v462_v11 }
 0x159   : > { %v483_v36 = vadd.f32 %v475_v19, %v409_v52 }
 0x15a   : > { %v464_v56 = vpop.permute.xlu0 %463 }
 0x15b   : > { %v466_v58 = vpop.permute.xlu1 %465 }
 0x15c   : > { %v476_v45 = vsel %vm400_vm11, %v464_v56, %v466_v58  ;;  %v599_v58 = vsel %vm595_vm12, %v1551_v33, %v1549_v54 }
 0x15d   : > { %v484_v3 = vadd.f32 %v476_v45, %v410_v40 }
 0x15e   : > { %v468_v63 = vpop.permute.xlu0 %467 }
 0x15f   : > { %v470_v62 = vpop.permute.xlu1 %469 }
 0x160   : > { %v477_v27 = vsel %vm400_vm11, %v468_v63, %v470_v62 }
 0x161   : > { %v485_v59 = vadd.f32 %v477_v27, %v411_v37 }
 0x162   : > { %v472_v15 = vpop.permute.xlu0 %471 }
 0x163   : > { %v474_v35 = vpop.permute.xlu1 %473 }
 0x164   : > { %v478_v24 = vsel %vm400_vm11, %v472_v15, %v474_v35 }
 0x165   : > { %v486_v8 = vadd.f32 %v478_v24, %v412_v29 }
 0x166   : > { %v534_v22 = vpop.permute.xlu0 %533 }
 0x167   : > { %v536_v57 = vpop.permute.xlu1 %535 }
 0x168   : > { %v549_v20 = vsel %vm400_vm11, %v534_v22, %v536_v57 }
 0x169   : > { %v557_v21 = vadd.f32 %v549_v20, %v483_v36 }
 0x16a   : > { %v538_v25 = vpop.permute.xlu0 %537 }
 0x16b   : > { %v540_v23 = vpop.permute.xlu1 %539  ;;  %v604_v26 = vadd.f32 %v596_v6, %v557_v21 }
 0x16c   : > { %v550_v41 = vsel %vm400_vm11, %v538_v25, %v540_v23 }
 0x16d   : > { %v558_v0 = vadd.f32 %v550_v41, %v484_v3 }
 0x16e   : > { %v542_v34 = vpop.permute.xlu0 %541 }
 0x16f   : > { %v544_v30 = vpop.permute.xlu1 %543  ;;  %v605_v42 = vadd.f32 %v597_v61, %v558_v0 }
 0x170   : > { %v551_v39 = vsel %vm400_vm11, %v542_v34, %v544_v30 }
 0x171   : > { %v559_v44 = vadd.f32 %v551_v39, %v485_v59 }
 0x172   : > { %v546_v31 = vpop.permute.xlu0 %545 }
 0x173   : > { %v548_v5 = vpop.permute.xlu1 %547  ;;  %v606_v32 = vadd.f32 %v598_v9, %v559_v44 }
 0x174   : > { %v552_v7 = vsel %vm400_vm11, %v546_v31, %v548_v5 }
 0x175   : > { %v560_v50 = vadd.f32 %v552_v7, %v486_v8 }
 0x176   : > { %v655_v17 = vpop.permute.xlu0 %654 }
 0x177   : > { %v657_v49 = vpop.permute.xlu1 %656  ;;  %v607_v63 = vadd.f32 %v599_v58, %v560_v50 }
 0x178   : > { %v670_v46 = vsel %vm595_vm12, %v655_v17, %v657_v49 }
 0x179   : > { %v678_v48 = vadd.f32 %v670_v46, %v604_v26 }
 0x17a   : > { %v659_v38 = vpop.permute.xlu0 %658 }
 0x17b   : > { %v661_v18 = vpop.permute.xlu1 %660 }
 0x17c   : > { %v671_v16 = vsel %vm595_vm12, %v659_v38, %v661_v18 }
 0x17d   : > { %v679_v9 = vadd.f32 %v671_v16, %v605_v42 }
 0x17e   : > { %v663_v13 = vpop.permute.xlu0 %662 }
 0x17f   : > { %v665_v2 = vpop.permute.xlu1 %664 }
 0x180   : > { %v672_v51 = vsel %vm595_vm12, %v663_v13, %v665_v2 }
 0x181   : > { %v680_v11 = vadd.f32 %v672_v51, %v606_v32 }
 0x182   : > { %v667_v4 = vpop.permute.xlu0 %666 }
 0x183   : > { %v669_v43 = vpop.permute.xlu1 %668 }
 0x184   : > { %v673_v56 = vsel %vm595_vm12, %v667_v4, %v669_v43 }
 0x185   : > { %v681_v15 = vadd.f32 %v673_v56, %v607_v63 }
 0x186   : > { %v729_v53 = vpop.permute.xlu0 %728 }
 0x187   : > { %v731_v52 = vpop.permute.xlu1 %730 }
 0x188   : > { %v744_v37 = vsel %vm595_vm12, %v729_v53, %v731_v52 }
 0x189   : > { %v752_v6 = vadd.f32 %v744_v37, %v678_v48 }
 0x18a   : > { %v733_v47 = vpop.permute.xlu0 %732 }
 0x18b   : > { %756 = vst [vmem:[%s202_s8] sm:$0xff] %v752_v6  ;;  %v735_v10 = vpop.permute.xlu1 %734 }
 0x18c   : > { %v745_v14 = vsel %vm595_vm12, %v733_v47, %v735_v10 }
 0x18d   : > { %v753_v28 = vadd.f32 %v745_v14, %v679_v9 }
 0x18e   : > { %v737_v55 = vpop.permute.xlu0 %736 }
 0x18f   : > { %757 = vst [vmem:[%s202_s8 + $0x8] sm:$0xff] %v753_v28  ;;  %v739_v12 = vpop.permute.xlu1 %738 }
 0x190   : > { %v746_v62 = vsel %vm595_vm12, %v737_v55, %v739_v12 }
 0x191   : > { %v754_v35 = vadd.f32 %v746_v62, %v680_v11 }
 0x192   : > { %v741_v36 = vpop.permute.xlu0 %740 }
 0x193   : > { %758 = vst [vmem:[%s202_s8 + $0x10] sm:$0xff] %v754_v35  ;;  %v743_v19 = vpop.permute.xlu1 %742 }
 0x194   : > { %v747_v54 = vsel %vm595_vm12, %v741_v36, %v743_v19 }
 0x195   : > { %v755_v33 = vadd.f32 %v747_v54, %v681_v15 }
 0x197   : > { %759 = vst [vmem:[%s202_s8 + $0x18] sm:$0xff] %v755_v33 }
 0x198   : > { %1007 = shalt.err (!%p1004_p0)
}
 0x199   : > { %s1008_s13 = scalar_lea.hbm %s1585_s27, 512  ;;  %s1012_s5 = scalar_lea.hbm %s1631_s3, 1024 }
 0x19a   : > { %p1009_p3 = scmp.ne.s32.totalorder %s1585_s27, %s1008_s13  ;;  %p1013_p11 = scmp.lt.s32.totalorder %s1585_s27, %s1631_s3 }
 0x19b   : > { %p1014_p12 = scmp.lt.s32.totalorder %s1012_s5, %s1008_s13 }
 0x19c   : > { %p1010_p5 = pnand %p1009_p3, %p1647_p7 }
 0x19d   : > { %p1015_p13 = por %p1014_p12, %p1013_p11 }
 0x19e   : > { %p1011_p4 = pneg %p1010_p5 }
 0x1a0   : > { %p1016_p1 = pnand %p1015_p13, %p1011_p4 }
 0x1a2   : > { %1019 = shalt.err (!%p1016_p1)
}
 0x1a3   : > { %s1073_s6 = smov 128   ;;  %s1074_s7 = smov 8  }
 0x1a4   : > { %896 = dma.vmem_to_hbm [thread:$0]  (%p1647_p7), %s1579_s9, 512, %s1585_s27, %s761_s24, %s1073_s6, %s1073_s6, %s1074_s7  }
 0x1a5 PF: > { %s790_s8 = sand.u32 1, %s1050_s14   ;;  %p1648_p6 = scmp.ne.s32.totalorder %s1639_s26, 0 }
 0x1a6   : > { %p1649_p8 = scmp.ge.s32.totalorder %s1062_s17, 2  ;;  %s791_s18 = scalar_lea.sflag [#allocation6], %s790_s8 }
 0x1a8   : > { %p907_p9 = pnand %p1649_p8, %p1648_p6 }
 0x1aa   : > { %p908_p10 = pneg %p907_p9 }
 0x1ac   : > { %1045 = dma.done.wait (%p908_p10), %s791_s18, 512  }
 0x1ad   : > { %1047 = vsyncadd (%p908_p10), %s791_s18, 4294966784  ;;  %p18_p2 = scmp.ge.s32.totalorder %s1123_s19, 4   ;;  %s1650_s14 = smov %s1054_s15 }
 0x1ae   : > { %s1651_s15 = smov %s1058_s16  ;;  %s1652_s16 = smov %s1135_s22 }
 0x1af   : > { %s1653_s17 = smov %s1123_s19  ;;  %20 = sbr.rel (!%p18_p2) target bundleno = 8 (0x8), region = 82 }
 0x1b4   :  { %796 = vsyncpa [#allocation5], 1 }
 0x1b5   :  { %798 = vsyncpa [#allocation5 + $0x1], 1 }
 0x1b6   :  { %799 = vsyncpa [#allocation6], 1 }
 0x1b7   :  { %801 = vsyncpa [#allocation6 + $0x1], 1 }
 0x1b8   :  { %802 = vsyncpa [#allocation7], 1 }
 0x1b9   :  { %804 = vsyncpa [#allocation7 + $0x1], 1 }

</bundles_post_ra>
